<compile_context>
chip_gen: v6e
topology: v6e:2x2x1
jax: 0.10.0
libtpu: 0.0.40
codegen_flags: <defaults>
</compile_context>

<pallas_src>
import jax
import jax.numpy as jnp
import numpy as np
from jax import lax
from jax.experimental import pallas as pl
from jax.experimental.pallas import tpu as pltpu


# ----------------------------------------------------------------------------
# Parameter construction (matches ContractiveREN._update_model_param)
# ----------------------------------------------------------------------------
def build_ren_params(key, dim_in, dim_out, dim_internal, dim_nl,
                     initialization_std=0.5, pos_def_tol=1e-3,
                     contraction_rate_lb=1.0):
    n, q = dim_internal, dim_nl
    ks = jax.random.split(key, 7)
    X   = jax.random.normal(ks[0], (2 * n + q, 2 * n + q), jnp.float32) * initialization_std
    Y   = jax.random.normal(ks[1], (n, n), jnp.float32) * initialization_std
    B2  = jax.random.normal(ks[2], (n, dim_in), jnp.float32) * initialization_std
    C2  = jax.random.normal(ks[3], (dim_out, n), jnp.float32) * initialization_std
    D21 = jax.random.normal(ks[4], (dim_out, q), jnp.float32) * initialization_std
    D22 = jax.random.normal(ks[5], (dim_out, dim_in), jnp.float32) * initialization_std
    D12 = jax.random.normal(ks[6], (q, dim_in), jnp.float32) * initialization_std

    H = X.T @ X + pos_def_tol * jnp.eye(2 * n + q, dtype=jnp.float32)
    H11 = H[:n, :n]
    H21 = H[n:n + q, :n]
    H22 = H[n:n + q, n:n + q]
    H31 = H[n + q:, :n]
    H32 = H[n + q:, n:n + q]
    H33 = H[n + q:, n + q:]

    P    = H33
    F_m  = H31                                           # (n, n)
    B1   = H32                                           # (n, q)
    E    = 0.5 * (H11 + contraction_rate_lb * P + Y - Y.T)
    # TODO(synk): matrix inverse has no clean Pallas primitive; computed once in JAX glue.
    E_inv = jnp.linalg.inv(E)                            # (n, n)
    Lam  = 0.5 * jnp.diag(H22)                           # (q,)
    D11  = -jnp.tril(H22, k=-1)                          # strictly lower triangular
    C1   = -H21                                          # (q, n)

    return dict(F=F_m, B1=B1, B2=B2, E_inv=E_inv, Lambda=Lam, C1=C1,
                D11=D11, D12=D12, C2=C2, D21=D21, D22=D22)


# ----------------------------------------------------------------------------
# Pallas kernel: one grid step per TIME CHUNK; x carried in VMEM scratch.
# ----------------------------------------------------------------------------
def _make_ren_kernel(b_pad, t_chunk, dim_internal, dim_nl, dim_out):
    n, q = dim_internal, dim_nl

    def kernel(u_ref,        # (t_chunk*b_pad, dim_in)
               Wu_ref,       # (dim_in, n+q+dim_out)   = [B2^T | D12^T | D22^T]
               Wxw_ref,      # (n+q, n)                = [F^T ; B1^T]
               EinvT_ref,    # (n, n)
               C1T_ref,      # (n, q)
               D11T_ref,     # (q, q)
               LamInv_ref,   # (1, q)                  = 1 / Lambda
               Wout_ref,     # (n+q, dim_out)          = [C2^T ; D21^T]
               y_ref,        # (t_chunk*b_pad, dim_out)
               x_scr,        # VMEM (b_pad, n)   state carried across chunks
               up_scr,       # VMEM (t_chunk*b_pad, n+q+dim_out) u-projections
               xall_scr,     # VMEM (t_chunk*b_pad, n)  x_{t+1} per timestep
               wall_scr):    # VMEM (t_chunk*b_pad, q)  w_t     per timestep
        chunk = pl.program_id(0)

        @pl.when(chunk == 0)
        def _():
            x_scr[...] = jnp.zeros_like(x_scr)

        # All u-dependent terms of the chunk in ONE MXU matmul:
        #   cols [0:n)     -> u @ B2^T
        #   cols [n:n+q)   -> u @ D12^T
        #   cols [n+q: )   -> u @ D22^T
        up_scr[...] = jnp.dot(u_ref[...], Wu_ref[...],
                              preferred_element_type=jnp.float32)

        # Hoisted loop invariants (loaded once per chunk).
        lam_inv = LamInv_ref[...]                        # (1, q)
        d11t    = D11T_ref[...]                          # (q, q)
        c1t     = C1T_ref[...]                           # (n, q)
        einvT   = EinvT_ref[...]                         # (n, n)
        wxw     = Wxw_ref[...]                           # (n+q, n)
        ft      = wxw[:n, :]                             # F^T
        b1t     = wxw[n:, :]                             # B1^T
        eye_q = (lax.broadcasted_iota(jnp.int32, (q, q), 0) ==
                 lax.broadcasted_iota(jnp.int32, (q, q), 1)).astype(jnp.float32)

        def step(t, x):
            base = pl.multiple_of(t * b_pad, 8)          # 8-sublane aligned
            up_t = up_scr[pl.ds(base, b_pad), :]         # (b_pad, n+q+dout)
            u_b2  = up_t[:, :n]
            u_d12 = up_t[:, n:n + q]

            # Equilibrium block: sequential in i because D11 is strictly
            # lower triangular. V0 computed once; per-i work is VPU/EUP only.
            v0 = jnp.dot(x, c1t, preferred_element_type=jnp.float32) + u_d12
            w   = jnp.zeros((b_pad, q), jnp.float32)
            acc = jnp.zeros((b_pad, q), jnp.float32)     # running D11-contribution
            for i in range(q):                           # q is small -> unrolled
                vi = v0[:, i:i + 1] + acc[:, i:i + 1]
                wi = jnp.tanh(vi * lam_inv[:, i:i + 1])  # (b_pad, 1)
                acc = acc + wi * d11t[i:i + 1, :]
                w   = w + wi * eye_q[i:i + 1, :]

            # State update: x_{t+1} = (x F^T + w B1^T + u B2^T) E_inv^T
            pre = (jnp.dot(x, ft, preferred_element_type=jnp.float32)
                   + jnp.dot(w, b1t, preferred_element_type=jnp.float32)
                   + u_b2)
            x_new = jnp.dot(pre, einvT, preferred_element_type=jnp.float32)

            xall_scr[pl.ds(base, b_pad), :] = x_new
            wall_scr[pl.ds(base, b_pad), :] = w
            return x_new

        x_final = lax.fori_loop(0, t_chunk, step, x_scr[...])
        x_scr[...] = x_final

        # Chunk-batched output map: y = x_new C2^T + w D21^T + u D22^T,
        # done as one matmul group + a single contiguous store.
        wo = Wout_ref[...]
        up_all = up_scr[...]                              # full load, then array slice
        y = (jnp.dot(xall_scr[...], wo[:n, :], preferred_element_type=jnp.float32)
             + jnp.dot(wall_scr[...], wo[n:, :], preferred_element_type=jnp.float32)
             + up_all[:, n + q:])
        y_ref[...] = y.astype(y_ref.dtype)

    return kernel


def ren_forward_pallas(u, params, t_chunk=None):
    """u: (batch, horizon, dim_in) -> y: (batch, horizon, dim_out)."""
    batch, horizon, dim_in = u.shape
    n = params["F"].shape[0]
    q = params["C1"].shape[0]
    dim_out = params["C2"].shape[0]

    # Chunking: whole horizon per grid step for small sequences, else 128.
    if t_chunk is None:
        t_chunk = horizon if horizon <= 128 else 128
    n_chunks = pl.cdiv(horizon, t_chunk)
    h_pad = n_chunks * t_chunk
    b_pad = ((batch + 7) // 8) * 8                     # pad batch to 8-sublane tile

    # Time-major, zero-pad (padded rows never feed back into real rows),
    # flatten time*batch into one lane-friendly 2-D slab.
    u_tm = jnp.transpose(u, (1, 0, 2)).astype(jnp.float32)          # (H, B, Din)
    u_tm = jnp.pad(u_tm, ((0, h_pad - horizon), (0, b_pad - batch), (0, 0)))
    u_flat = u_tm.reshape(h_pad * b_pad, dim_in)

    # Fused / pre-transposed weights (fewer kernel inputs, fewer pipeline slots).
    Wu    = jnp.concatenate([params["B2"].T, params["D12"].T, params["D22"].T],
                            axis=1).astype(jnp.float32)             # (din, n+q+dout)
    Wxw   = jnp.concatenate([params["F"].T, params["B1"].T],
                            axis=0).astype(jnp.float32)             # (n+q, n)
    Wout  = jnp.concatenate([params["C2"].T, params["D21"].T],
                            axis=0).astype(jnp.float32)             # (n+q, dout)
    EinvT = params["E_inv"].T.astype(jnp.float32)
    C1T   = params["C1"].T.astype(jnp.float32)
    D11T  = params["D11"].T.astype(jnp.float32)
    LamInv = (1.0 / params["Lambda"]).reshape(1, q).astype(jnp.float32)

    kernel = _make_ren_kernel(b_pad, t_chunk, n, q, dim_out)

    def const_spec(arr):
        return pl.BlockSpec(arr.shape, lambda c: (0,) * arr.ndim)

    rows = t_chunk * b_pad
    grid_spec = pltpu.PrefetchScalarGridSpec(
        num_scalar_prefetch=0,
        grid=(n_chunks,),
        in_specs=[
            pl.BlockSpec((rows, dim_in), lambda c: (c, 0)),
            const_spec(Wu), const_spec(Wxw), const_spec(EinvT),
            const_spec(C1T), const_spec(D11T), const_spec(LamInv),
            const_spec(Wout),
        ],
        out_specs=pl.BlockSpec((rows, dim_out), lambda c: (c, 0)),
        scratch_shapes=[
            pltpu.VMEM((b_pad, n), jnp.float32),                 # x carry
            pltpu.VMEM((rows, n + q + dim_out), jnp.float32),    # u projections
            pltpu.VMEM((rows, n), jnp.float32),                  # x_{t+1} per t
            pltpu.VMEM((rows, q), jnp.float32),                  # w_t per t
        ],
    )

    y_flat = pl.pallas_call(
        kernel,
        grid_spec=grid_spec,
        out_shape=jax.ShapeDtypeStruct((h_pad * b_pad, dim_out), jnp.float32),
        compiler_params=pltpu.CompilerParams(
            dimension_semantics=("arbitrary",)),   # time chunks carry state
    )(u_flat, Wu, Wxw, EinvT, C1T, D11T, LamInv, Wout)

    y_tm = y_flat.reshape(h_pad, b_pad, dim_out)[:horizon, :batch, :]
    return jnp.transpose(y_tm, (1, 0, 2))


# ----------------------------------------------------------------------------
# Pure-JAX reference (mirrors the PyTorch forward) for validation.
# ----------------------------------------------------------------------------
def ren_forward_ref(u, params):
    F_m, B1, B2 = params["F"], params["B1"], params["B2"]
    E_inv, Lam = params["E_inv"], params["Lambda"]
    C1, D11, D12 = params["C1"], params["D11"], params["D12"]
    C2, D21, D22 = params["C2"], params["D21"], params["D22"]
    batch, horizon, _ = u.shape
    n = F_m.shape[0]
    q = C1.shape[0]
    x = jnp.zeros((batch, n), jnp.float32)
    ys = []
    for t in range(horizon):
        ut = u[:, t, :]
        w = jnp.zeros((batch, q), jnp.float32)
        for i in range(q):
            v = x @ C1[i] + w @ D11[i] + ut @ D12[i]
            w = w.at[:, i].set(jnp.tanh(v / Lam[i]))
        x = (x @ F_m.T + w @ B1.T + ut @ B2.T) @ E_inv.T
        ys.append(x @ C2.T + w @ D21.T + ut @ D22.T)
    return jnp.stack(ys, axis=1)


if __name__ == "__main__":
    # Small shapes consistent with the module's forward.
    batch, horizon = 2, 8
    dim_in, dim_out, dim_internal, dim_nl = 4, 3, 8, 8

    key = jax.random.PRNGKey(0)
    k_params, k_u = jax.random.split(key)
    params = build_ren_params(k_params, dim_in, dim_out, dim_internal, dim_nl)
    u = jax.random.normal(k_u, (batch, horizon, dim_in), jnp.float32)

    y = ren_forward_pallas(u, params)
    jax.block_until_ready(y)

    y_ref = ren_forward_ref(u, params)
    np.testing.assert_allclose(np.asarray(y), np.asarray(y_ref), rtol=1e-2, atol=1e-2)

    assert y.shape == (batch, horizon, dim_out)
    print("KERNEL_OK")
</pallas_src>

<mosaic_0001>
module attributes {stable_mosaic.version = 11 : i64} {
  func.func @kernel(%arg0: i32, %arg1: memref<64x4xf32, #tpu.memory_space<vmem>>, %arg2: memref<4x19xf32, #tpu.memory_space<vmem>>, %arg3: memref<16x8xf32, #tpu.memory_space<vmem>>, %arg4: memref<8x8xf32, #tpu.memory_space<vmem>>, %arg5: memref<8x8xf32, #tpu.memory_space<vmem>>, %arg6: memref<8x8xf32, #tpu.memory_space<vmem>>, %arg7: memref<1x8xf32, #tpu.memory_space<vmem>>, %arg8: memref<16x3xf32, #tpu.memory_space<vmem>>, %arg9: memref<64x3xf32, #tpu.memory_space<vmem>>, %arg10: memref<8x8xf32, #tpu.memory_space<vmem>>, %arg11: memref<64x19xf32, #tpu.memory_space<vmem>>, %arg12: memref<64x8xf32, #tpu.memory_space<vmem>>, %arg13: memref<64x8xf32, #tpu.memory_space<vmem>>) attributes {dimension_semantics = [#tpu.dimension_semantics<arbitrary>], iteration_bounds = array<i64: 1>, scalar_prefetch = 0 : i64, scratch_operands = 4 : i64, tpu.core_type = #tpu.core_type<tc>, window_params = [{transform_indices = @transform_0, window_bounds = array<i64: 64, 4>}, {pipeline_mode = #tpu.pipeline_mode<synchronous>, transform_indices = @transform_1, window_bounds = array<i64: 4, 19>}, {pipeline_mode = #tpu.pipeline_mode<synchronous>, transform_indices = @transform_2, window_bounds = array<i64: 16, 8>}, {pipeline_mode = #tpu.pipeline_mode<synchronous>, transform_indices = @transform_3, window_bounds = array<i64: 8, 8>}, {pipeline_mode = #tpu.pipeline_mode<synchronous>, transform_indices = @transform_4, window_bounds = array<i64: 8, 8>}, {pipeline_mode = #tpu.pipeline_mode<synchronous>, transform_indices = @transform_5, window_bounds = array<i64: 8, 8>}, {pipeline_mode = #tpu.pipeline_mode<synchronous>, transform_indices = @transform_6, window_bounds = array<i64: 1, 8>}, {pipeline_mode = #tpu.pipeline_mode<synchronous>, transform_indices = @transform_7, window_bounds = array<i64: 16, 3>}, {transform_indices = @transform_8, window_bounds = array<i64: 64, 3>}]} {
    %c0_i32 = arith.constant 0 : i32
    %0 = arith.cmpi eq, %arg0, %c0_i32 : i32
    %1 = arith.extui %0 : i1 to i32
    %c0_i32_0 = arith.constant 0 : i32
    %2 = arith.cmpi ne, %1, %c0_i32_0 : i32
    scf.if %2 {
      %cst_34 = arith.constant 0.000000e+00 : f32
      %35 = vector.broadcast %cst_34 : f32 to vector<8x8xf32>
      %c0_35 = arith.constant 0 : index
      %c0_36 = arith.constant 0 : index
      %36 = vector.load %arg10[%c0_35, %c0_36] : memref<8x8xf32, #tpu.memory_space<vmem>>, vector<8x8xf32>
      tpu.vector_store %arg10[%c0_35, %c0_36], %35 {strides = array<i32>} : memref<8x8xf32, #tpu.memory_space<vmem>>, vector<8x8xf32>,
    } else {
    }
    %c0 = arith.constant 0 : index
    %c0_1 = arith.constant 0 : index
    %3 = vector.load %arg1[%c0, %c0_1] : memref<64x4xf32, #tpu.memory_space<vmem>>, vector<64x4xf32>
    %c0_2 = arith.constant 0 : index
    %c0_3 = arith.constant 0 : index
    %4 = vector.load %arg2[%c0_2, %c0_3] : memref<4x19xf32, #tpu.memory_space<vmem>>, vector<4x19xf32>
    %cst = arith.constant dense<0.000000e+00> : vector<64x19xf32>
    %5 = tpu.matmul %3, %4, %cst {dimension_numbers = #tpu.dot_dimension_numbers<[1], [0], [0], [1], [0, 0, 1, 1], [], []>} : vector<64x4xf32>, vector<4x19xf32>, vector<64x19xf32> -> vector<64x19xf32>
    %c0_4 = arith.constant 0 : index
    %c0_5 = arith.constant 0 : index
    %6 = vector.load %arg11[%c0_4, %c0_5] : memref<64x19xf32, #tpu.memory_space<vmem>>, vector<64x19xf32>
    tpu.vector_store %arg11[%c0_4, %c0_5], %5 {strides = array<i32>} : memref<64x19xf32, #tpu.memory_space<vmem>>, vector<64x19xf32>,
    %c0_6 = arith.constant 0 : index
    %c0_7 = arith.constant 0 : index
    %7 = vector.load %arg7[%c0_6, %c0_7] : memref<1x8xf32, #tpu.memory_space<vmem>>, vector<1x8xf32>
    %c0_8 = arith.constant 0 : index
    %c0_9 = arith.constant 0 : index
    %8 = vector.load %arg6[%c0_8, %c0_9] : memref<8x8xf32, #tpu.memory_space<vmem>>, vector<8x8xf32>
    %c0_10 = arith.constant 0 : index
    %c0_11 = arith.constant 0 : index
    %9 = vector.load %arg5[%c0_10, %c0_11] : memref<8x8xf32, #tpu.memory_space<vmem>>, vector<8x8xf32>
    %c0_12 = arith.constant 0 : index
    %c0_13 = arith.constant 0 : index
    %10 = vector.load %arg4[%c0_12, %c0_13] : memref<8x8xf32, #tpu.memory_space<vmem>>, vector<8x8xf32>
    %c0_14 = arith.constant 0 : index
    %c0_15 = arith.constant 0 : index
    %11 = vector.load %arg3[%c0_14, %c0_15] : memref<16x8xf32, #tpu.memory_space<vmem>>, vector<16x8xf32>
    %12 = vector.extract_strided_slice %11 {offsets = [0, 0], sizes = [8, 8], strides = [1, 1]} : vector<16x8xf32> to vector<8x8xf32>
    %13 = vector.extract_strided_slice %11 {offsets = [8, 0], sizes = [8, 8], strides = [1, 1]} : vector<16x8xf32> to vector<8x8xf32>
    %14 = tpu.iota {dimensions = array<i32: 0>} : vector<8x8xi32>
    %15 = tpu.iota {dimensions = array<i32: 1>} : vector<8x8xi32>
    %16 = arith.cmpi eq, %14, %15 : vector<8x8xi32>
    %17 = arith.extui %16 : vector<8x8xi1> to vector<8x8xi32>
    %18 = arith.sitofp %17 : vector<8x8xi32> to vector<8x8xf32>
    %c0_16 = arith.constant 0 : index
    %c0_17 = arith.constant 0 : index
    %19 = vector.load %arg10[%c0_16, %c0_17] : memref<8x8xf32, #tpu.memory_space<vmem>>, vector<8x8xf32>
    %c0_i32_18 = arith.constant 0 : i32
    %c8_i32 = arith.constant 8 : i32
    %20 = arith.addi %c0_i32_18, %c8_i32 : i32
    %c1_i32 = arith.constant 1 : i32
    %21 = scf.for %arg14 = %c0_i32_18 to %20 step %c1_i32 iter_args(%arg15 = %19) -> (vector<8x8xf32>)  : i32 {
      %c8_i32_34 = arith.constant 8 : i32
      %35 = arith.muli %arg14, %c8_i32_34 : i32
      %36 = tpu.assume_multiple %35, 8 : i32
      %37 = arith.index_cast %36 : i32 to index
      %c0_35 = arith.constant 0 : index
      %38 = vector.load %arg11[%37, %c0_35] : memref<64x19xf32, #tpu.memory_space<vmem>>, vector<8x19xf32>
      %39 = vector.extract_strided_slice %38 {offsets = [0, 0], sizes = [8, 8], strides = [1, 1]} : vector<8x19xf32> to vector<8x8xf32>
      %40 = vector.extract_strided_slice %38 {offsets = [0, 8], sizes = [8, 8], strides = [1, 1]} : vector<8x19xf32> to vector<8x8xf32>
      %cst_36 = arith.constant dense<0.000000e+00> : vector<8x8xf32>
      %41 = tpu.matmul %arg15, %9, %cst_36 {dimension_numbers = #tpu.dot_dimension_numbers<[1], [0], [0], [1], [0, 0, 1, 1], [], []>} : vector<8x8xf32>, vector<8x8xf32>, vector<8x8xf32> -> vector<8x8xf32>
      %42 = arith.addf %41, %40 : vector<8x8xf32>
      %cst_37 = arith.constant 0.000000e+00 : f32
      %43 = vector.broadcast %cst_37 : f32 to vector<8x8xf32>
      %cst_38 = arith.constant 0.000000e+00 : f32
      %44 = vector.broadcast %cst_38 : f32 to vector<8x8xf32>
      %45 = vector.extract_strided_slice %42 {offsets = [0, 0], sizes = [8, 1], strides = [1, 1]} : vector<8x8xf32> to vector<8x1xf32>
      %46 = vector.extract_strided_slice %44 {offsets = [0, 0], sizes = [8, 1], strides = [1, 1]} : vector<8x8xf32> to vector<8x1xf32>
      %47 = arith.addf %45, %46 : vector<8x1xf32>
      %48 = vector.extract_strided_slice %7 {offsets = [0, 0], sizes = [1, 1], strides = [1, 1]} : vector<1x8xf32> to vector<1x1xf32>
      %49 = vector.broadcast %48 : vector<1x1xf32> to vector<8x1xf32>
      %50 = arith.mulf %47, %49 : vector<8x1xf32>
      %51 = math.tanh %50 : vector<8x1xf32>
      %52 = vector.extract_strided_slice %8 {offsets = [0, 0], sizes = [1, 8], strides = [1, 1]} : vector<8x8xf32> to vector<1x8xf32>
      %53 = vector.broadcast %51 : vector<8x1xf32> to vector<8x8xf32>
      %54 = vector.broadcast %52 : vector<1x8xf32> to vector<8x8xf32>
      %55 = arith.mulf %53, %54 : vector<8x8xf32>
      %56 = arith.addf %44, %55 : vector<8x8xf32>
      %57 = vector.extract_strided_slice %18 {offsets = [0, 0], sizes = [1, 8], strides = [1, 1]} : vector<8x8xf32> to vector<1x8xf32>
      %58 = vector.broadcast %51 : vector<8x1xf32> to vector<8x8xf32>
      %59 = vector.broadcast %57 : vector<1x8xf32> to vector<8x8xf32>
      %60 = arith.mulf %58, %59 : vector<8x8xf32>
      %61 = arith.addf %43, %60 : vector<8x8xf32>
      %62 = vector.extract_strided_slice %42 {offsets = [0, 1], sizes = [8, 1], strides = [1, 1]} : vector<8x8xf32> to vector<8x1xf32>
      %63 = vector.extract_strided_slice %56 {offsets = [0, 1], sizes = [8, 1], strides = [1, 1]} : vector<8x8xf32> to vector<8x1xf32>
      %64 = arith.addf %62, %63 : vector<8x1xf32>
      %65 = vector.extract_strided_slice %7 {offsets = [0, 1], sizes = [1, 1], strides = [1, 1]} : vector<1x8xf32> to vector<1x1xf32>
      %66 = vector.broadcast %65 : vector<1x1xf32> to vector<8x1xf32>
      %67 = arith.mulf %64, %66 : vector<8x1xf32>
      %68 = math.tanh %67 : vector<8x1xf32>
      %69 = vector.extract_strided_slice %8 {offsets = [1, 0], sizes = [1, 8], strides = [1, 1]} : vector<8x8xf32> to vector<1x8xf32>
      %70 = vector.broadcast %68 : vector<8x1xf32> to vector<8x8xf32>
      %71 = vector.broadcast %69 : vector<1x8xf32> to vector<8x8xf32>
      %72 = arith.mulf %70, %71 : vector<8x8xf32>
      %73 = arith.addf %56, %72 : vector<8x8xf32>
      %74 = vector.extract_strided_slice %18 {offsets = [1, 0], sizes = [1, 8], strides = [1, 1]} : vector<8x8xf32> to vector<1x8xf32>
      %75 = vector.broadcast %68 : vector<8x1xf32> to vector<8x8xf32>
      %76 = vector.broadcast %74 : vector<1x8xf32> to vector<8x8xf32>
      %77 = arith.mulf %75, %76 : vector<8x8xf32>
      %78 = arith.addf %61, %77 : vector<8x8xf32>
      %79 = vector.extract_strided_slice %42 {offsets = [0, 2], sizes = [8, 1], strides = [1, 1]} : vector<8x8xf32> to vector<8x1xf32>
      %80 = vector.extract_strided_slice %73 {offsets = [0, 2], sizes = [8, 1], strides = [1, 1]} : vector<8x8xf32> to vector<8x1xf32>
      %81 = arith.addf %79, %80 : vector<8x1xf32>
      %82 = vector.extract_strided_slice %7 {offsets = [0, 2], sizes = [1, 1], strides = [1, 1]} : vector<1x8xf32> to vector<1x1xf32>
      %83 = vector.broadcast %82 : vector<1x1xf32> to vector<8x1xf32>
      %84 = arith.mulf %81, %83 : vector<8x1xf32>
      %85 = math.tanh %84 : vector<8x1xf32>
      %86 = vector.extract_strided_slice %8 {offsets = [2, 0], sizes = [1, 8], strides = [1, 1]} : vector<8x8xf32> to vector<1x8xf32>
      %87 = vector.broadcast %85 : vector<8x1xf32> to vector<8x8xf32>
      %88 = vector.broadcast %86 : vector<1x8xf32> to vector<8x8xf32>
      %89 = arith.mulf %87, %88 : vector<8x8xf32>
      %90 = arith.addf %73, %89 : vector<8x8xf32>
      %91 = vector.extract_strided_slice %18 {offsets = [2, 0], sizes = [1, 8], strides = [1, 1]} : vector<8x8xf32> to vector<1x8xf32>
      %92 = vector.broadcast %85 : vector<8x1xf32> to vector<8x8xf32>
      %93 = vector.broadcast %91 : vector<1x8xf32> to vector<8x8xf32>
      %94 = arith.mulf %92, %93 : vector<8x8xf32>
      %95 = arith.addf %78, %94 : vector<8x8xf32>
      %96 = vector.extract_strided_slice %42 {offsets = [0, 3], sizes = [8, 1], strides = [1, 1]} : vector<8x8xf32> to vector<8x1xf32>
      %97 = vector.extract_strided_slice %90 {offsets = [0, 3], sizes = [8, 1], strides = [1, 1]} : vector<8x8xf32> to vector<8x1xf32>
      %98 = arith.addf %96, %97 : vector<8x1xf32>
      %99 = vector.extract_strided_slice %7 {offsets = [0, 3], sizes = [1, 1], strides = [1, 1]} : vector<1x8xf32> to vector<1x1xf32>
      %100 = vector.broadcast %99 : vector<1x1xf32> to vector<8x1xf32>
      %101 = arith.mulf %98, %100 : vector<8x1xf32>
      %102 = math.tanh %101 : vector<8x1xf32>
      %103 = vector.extract_strided_slice %8 {offsets = [3, 0], sizes = [1, 8], strides = [1, 1]} : vector<8x8xf32> to vector<1x8xf32>
      %104 = vector.broadcast %102 : vector<8x1xf32> to vector<8x8xf32>
      %105 = vector.broadcast %103 : vector<1x8xf32> to vector<8x8xf32>
      %106 = arith.mulf %104, %105 : vector<8x8xf32>
      %107 = arith.addf %90, %106 : vector<8x8xf32>
      %108 = vector.extract_strided_slice %18 {offsets = [3, 0], sizes = [1, 8], strides = [1, 1]} : vector<8x8xf32> to vector<1x8xf32>
      %109 = vector.broadcast %102 : vector<8x1xf32> to vector<8x8xf32>
      %110 = vector.broadcast %108 : vector<1x8xf32> to vector<8x8xf32>
      %111 = arith.mulf %109, %110 : vector<8x8xf32>
      %112 = arith.addf %95, %111 : vector<8x8xf32>
      %113 = vector.extract_strided_slice %42 {offsets = [0, 4], sizes = [8, 1], strides = [1, 1]} : vector<8x8xf32> to vector<8x1xf32>
      %114 = vector.extract_strided_slice %107 {offsets = [0, 4], sizes = [8, 1], strides = [1, 1]} : vector<8x8xf32> to vector<8x1xf32>
      %115 = arith.addf %113, %114 : vector<8x1xf32>
      %116 = vector.extract_strided_slice %7 {offsets = [0, 4], sizes = [1, 1], strides = [1, 1]} : vector<1x8xf32> to vector<1x1xf32>
      %117 = vector.broadcast %116 : vector<1x1xf32> to vector<8x1xf32>
      %118 = arith.mulf %115, %117 : vector<8x1xf32>
      %119 = math.tanh %118 : vector<8x1xf32>
      %120 = vector.extract_strided_slice %8 {offsets = [4, 0], sizes = [1, 8], strides = [1, 1]} : vector<8x8xf32> to vector<1x8xf32>
      %121 = vector.broadcast %119 : vector<8x1xf32> to vector<8x8xf32>
      %122 = vector.broadcast %120 : vector<1x8xf32> to vector<8x8xf32>
      %123 = arith.mulf %121, %122 : vector<8x8xf32>
      %124 = arith.addf %107, %123 : vector<8x8xf32>
      %125 = vector.extract_strided_slice %18 {offsets = [4, 0], sizes = [1, 8], strides = [1, 1]} : vector<8x8xf32> to vector<1x8xf32>
      %126 = vector.broadcast %119 : vector<8x1xf32> to vector<8x8xf32>
      %127 = vector.broadcast %125 : vector<1x8xf32> to vector<8x8xf32>
      %128 = arith.mulf %126, %127 : vector<8x8xf32>
      %129 = arith.addf %112, %128 : vector<8x8xf32>
      %130 = vector.extract_strided_slice %42 {offsets = [0, 5], sizes = [8, 1], strides = [1, 1]} : vector<8x8xf32> to vector<8x1xf32>
      %131 = vector.extract_strided_slice %124 {offsets = [0, 5], sizes = [8, 1], strides = [1, 1]} : vector<8x8xf32> to vector<8x1xf32>
      %132 = arith.addf %130, %131 : vector<8x1xf32>
      %133 = vector.extract_strided_slice %7 {offsets = [0, 5], sizes = [1, 1], strides = [1, 1]} : vector<1x8xf32> to vector<1x1xf32>
      %134 = vector.broadcast %133 : vector<1x1xf32> to vector<8x1xf32>
      %135 = arith.mulf %132, %134 : vector<8x1xf32>
      %136 = math.tanh %135 : vector<8x1xf32>
      %137 = vector.extract_strided_slice %8 {offsets = [5, 0], sizes = [1, 8], strides = [1, 1]} : vector<8x8xf32> to vector<1x8xf32>
      %138 = vector.broadcast %136 : vector<8x1xf32> to vector<8x8xf32>
      %139 = vector.broadcast %137 : vector<1x8xf32> to vector<8x8xf32>
      %140 = arith.mulf %138, %139 : vector<8x8xf32>
      %141 = arith.addf %124, %140 : vector<8x8xf32>
      %142 = vector.extract_strided_slice %18 {offsets = [5, 0], sizes = [1, 8], strides = [1, 1]} : vector<8x8xf32> to vector<1x8xf32>
      %143 = vector.broadcast %136 : vector<8x1xf32> to vector<8x8xf32>
      %144 = vector.broadcast %142 : vector<1x8xf32> to vector<8x8xf32>
      %145 = arith.mulf %143, %144 : vector<8x8xf32>
      %146 = arith.addf %129, %145 : vector<8x8xf32>
      %147 = vector.extract_strided_slice %42 {offsets = [0, 6], sizes = [8, 1], strides = [1, 1]} : vector<8x8xf32> to vector<8x1xf32>
      %148 = vector.extract_strided_slice %141 {offsets = [0, 6], sizes = [8, 1], strides = [1, 1]} : vector<8x8xf32> to vector<8x1xf32>
      %149 = arith.addf %147, %148 : vector<8x1xf32>
      %150 = vector.extract_strided_slice %7 {offsets = [0, 6], sizes = [1, 1], strides = [1, 1]} : vector<1x8xf32> to vector<1x1xf32>
      %151 = vector.broadcast %150 : vector<1x1xf32> to vector<8x1xf32>
      %152 = arith.mulf %149, %151 : vector<8x1xf32>
      %153 = math.tanh %152 : vector<8x1xf32>
      %154 = vector.extract_strided_slice %8 {offsets = [6, 0], sizes = [1, 8], strides = [1, 1]} : vector<8x8xf32> to vector<1x8xf32>
      %155 = vector.broadcast %153 : vector<8x1xf32> to vector<8x8xf32>
      %156 = vector.broadcast %154 : vector<1x8xf32> to vector<8x8xf32>
      %157 = arith.mulf %155, %156 : vector<8x8xf32>
      %158 = arith.addf %141, %157 : vector<8x8xf32>
      %159 = vector.extract_strided_slice %18 {offsets = [6, 0], sizes = [1, 8], strides = [1, 1]} : vector<8x8xf32> to vector<1x8xf32>
      %160 = vector.broadcast %153 : vector<8x1xf32> to vector<8x8xf32>
      %161 = vector.broadcast %159 : vector<1x8xf32> to vector<8x8xf32>
      %162 = arith.mulf %160, %161 : vector<8x8xf32>
      %163 = arith.addf %146, %162 : vector<8x8xf32>
      %164 = vector.extract_strided_slice %42 {offsets = [0, 7], sizes = [8, 1], strides = [1, 1]} : vector<8x8xf32> to vector<8x1xf32>
      %165 = vector.extract_strided_slice %158 {offsets = [0, 7], sizes = [8, 1], strides = [1, 1]} : vector<8x8xf32> to vector<8x1xf32>
      %166 = arith.addf %164, %165 : vector<8x1xf32>
      %167 = vector.extract_strided_slice %7 {offsets = [0, 7], sizes = [1, 1], strides = [1, 1]} : vector<1x8xf32> to vector<1x1xf32>
      %168 = vector.broadcast %167 : vector<1x1xf32> to vector<8x1xf32>
      %169 = arith.mulf %166, %168 : vector<8x1xf32>
      %170 = math.tanh %169 : vector<8x1xf32>
      %171 = vector.extract_strided_slice %18 {offsets = [7, 0], sizes = [1, 8], strides = [1, 1]} : vector<8x8xf32> to vector<1x8xf32>
      %172 = vector.broadcast %170 : vector<8x1xf32> to vector<8x8xf32>
      %173 = vector.broadcast %171 : vector<1x8xf32> to vector<8x8xf32>
      %174 = arith.mulf %172, %173 : vector<8x8xf32>
      %175 = arith.addf %163, %174 : vector<8x8xf32>
      %cst_39 = arith.constant dense<0.000000e+00> : vector<8x8xf32>
      %176 = tpu.matmul %arg15, %12, %cst_39 {dimension_numbers = #tpu.dot_dimension_numbers<[1], [0], [0], [1], [0, 0, 1, 1], [], []>} : vector<8x8xf32>, vector<8x8xf32>, vector<8x8xf32> -> vector<8x8xf32>
      %cst_40 = arith.constant dense<0.000000e+00> : vector<8x8xf32>
      %177 = tpu.matmul %175, %13, %cst_40 {dimension_numbers = #tpu.dot_dimension_numbers<[1], [0], [0], [1], [0, 0, 1, 1], [], []>} : vector<8x8xf32>, vector<8x8xf32>, vector<8x8xf32> -> vector<8x8xf32>
      %178 = arith.addf %176, %177 : vector<8x8xf32>
      %179 = arith.addf %178, %39 : vector<8x8xf32>
      %cst_41 = arith.constant dense<0.000000e+00> : vector<8x8xf32>
      %180 = tpu.matmul %179, %10, %cst_41 {dimension_numbers = #tpu.dot_dimension_numbers<[1], [0], [0], [1], [0, 0, 1, 1], [], []>} : vector<8x8xf32>, vector<8x8xf32>, vector<8x8xf32> -> vector<8x8xf32>
      %181 = arith.index_cast %36 : i32 to index
      %c0_42 = arith.constant 0 : index
      %182 = vector.load %arg12[%181, %c0_42] : memref<64x8xf32, #tpu.memory_space<vmem>>, vector<8x8xf32>
      tpu.vector_store %arg12[%181, %c0_42], %180 {strides = array<i32>} : memref<64x8xf32, #tpu.memory_space<vmem>>, vector<8x8xf32>,
      %183 = arith.index_cast %36 : i32 to index
      %c0_43 = arith.constant 0 : index
      %184 = vector.load %arg13[%183, %c0_43] : memref<64x8xf32, #tpu.memory_space<vmem>>, vector<8x8xf32>
      tpu.vector_store %arg13[%183, %c0_43], %175 {strides = array<i32>} : memref<64x8xf32, #tpu.memory_space<vmem>>, vector<8x8xf32>,
      scf.yield %180 : vector<8x8xf32>
    }
    %c8_i32_19 = arith.constant 8 : i32
    %c0_20 = arith.constant 0 : index
    %c0_21 = arith.constant 0 : index
    %22 = vector.load %arg10[%c0_20, %c0_21] : memref<8x8xf32, #tpu.memory_space<vmem>>, vector<8x8xf32>
    tpu.vector_store %arg10[%c0_20, %c0_21], %21 {strides = array<i32>} : memref<8x8xf32, #tpu.memory_space<vmem>>, vector<8x8xf32>,
    %c0_22 = arith.constant 0 : index
    %c0_23 = arith.constant 0 : index
    %23 = vector.load %arg8[%c0_22, %c0_23] : memref<16x3xf32, #tpu.memory_space<vmem>>, vector<16x3xf32>
    %c0_24 = arith.constant 0 : index
    %c0_25 = arith.constant 0 : index
    %24 = vector.load %arg11[%c0_24, %c0_25] : memref<64x19xf32, #tpu.memory_space<vmem>>, vector<64x19xf32>
    %c0_26 = arith.constant 0 : index
    %c0_27 = arith.constant 0 : index
    %25 = vector.load %arg12[%c0_26, %c0_27] : memref<64x8xf32, #tpu.memory_space<vmem>>, vector<64x8xf32>
    %26 = vector.extract_strided_slice %23 {offsets = [0, 0], sizes = [8, 3], strides = [1, 1]} : vector<16x3xf32> to vector<8x3xf32>
    %cst_28 = arith.constant dense<0.000000e+00> : vector<64x3xf32>
    %27 = tpu.matmul %25, %26, %cst_28 {dimension_numbers = #tpu.dot_dimension_numbers<[1], [0], [0], [1], [0, 0, 1, 1], [], []>} : vector<64x8xf32>, vector<8x3xf32>, vector<64x3xf32> -> vector<64x3xf32>
    %c0_29 = arith.constant 0 : index
    %c0_30 = arith.constant 0 : index
    %28 = vector.load %arg13[%c0_29, %c0_30] : memref<64x8xf32, #tpu.memory_space<vmem>>, vector<64x8xf32>
    %29 = vector.extract_strided_slice %23 {offsets = [8, 0], sizes = [8, 3], strides = [1, 1]} : vector<16x3xf32> to vector<8x3xf32>
    %cst_31 = arith.constant dense<0.000000e+00> : vector<64x3xf32>
    %30 = tpu.matmul %28, %29, %cst_31 {dimension_numbers = #tpu.dot_dimension_numbers<[1], [0], [0], [1], [0, 0, 1, 1], [], []>} : vector<64x8xf32>, vector<8x3xf32>, vector<64x3xf32> -> vector<64x3xf32>
    %31 = arith.addf %27, %30 : vector<64x3xf32>
    %32 = vector.extract_strided_slice %24 {offsets = [0, 16], sizes = [64, 3], strides = [1, 1]} : vector<64x19xf32> to vector<64x3xf32>
    %33 = arith.addf %31, %32 : vector<64x3xf32>
    %c0_32 = arith.constant 0 : index
    %c0_33 = arith.constant 0 : index
    %34 = vector.load %arg9[%c0_32, %c0_33] : memref<64x3xf32, #tpu.memory_space<vmem>>, vector<64x3xf32>
    tpu.vector_store %arg9[%c0_32, %c0_33], %33 {strides = array<i32>} : memref<64x3xf32, #tpu.memory_space<vmem>>, vector<64x3xf32>,
    return
  }
  func.func @transform_0(%arg0: i32) -> (i32, i32) {
    %c0_i32 = arith.constant 0 : i32
    %c0_i32_0 = arith.constant 0 : i32
    return %arg0, %c0_i32 : i32, i32
  }
  func.func @transform_1(%arg0: i32) -> (i32, i32) {
    %c0_i32 = arith.constant 0 : i32
    %c0_i32_0 = arith.constant 0 : i32
    %c0_i32_1 = arith.constant 0 : i32
    return %c0_i32, %c0_i32_0 : i32, i32
  }
  func.func @transform_2(%arg0: i32) -> (i32, i32) {
    %c0_i32 = arith.constant 0 : i32
    %c0_i32_0 = arith.constant 0 : i32
    %c0_i32_1 = arith.constant 0 : i32
    return %c0_i32, %c0_i32_0 : i32, i32
  }
  func.func @transform_3(%arg0: i32) -> (i32, i32) {
    %c0_i32 = arith.constant 0 : i32
    %c0_i32_0 = arith.constant 0 : i32
    %c0_i32_1 = arith.constant 0 : i32
    return %c0_i32, %c0_i32_0 : i32, i32
  }
  func.func @transform_4(%arg0: i32) -> (i32, i32) {
    %c0_i32 = arith.constant 0 : i32
    %c0_i32_0 = arith.constant 0 : i32
    %c0_i32_1 = arith.constant 0 : i32
    return %c0_i32, %c0_i32_0 : i32, i32
  }
  func.func @transform_5(%arg0: i32) -> (i32, i32) {
    %c0_i32 = arith.constant 0 : i32
    %c0_i32_0 = arith.constant 0 : i32
    %c0_i32_1 = arith.constant 0 : i32
    return %c0_i32, %c0_i32_0 : i32, i32
  }
  func.func @transform_6(%arg0: i32) -> (i32, i32) {
    %c0_i32 = arith.constant 0 : i32
    %c0_i32_0 = arith.constant 0 : i32
    %c0_i32_1 = arith.constant 0 : i32
    return %c0_i32, %c0_i32_0 : i32, i32
  }
  func.func @transform_7(%arg0: i32) -> (i32, i32) {
    %c0_i32 = arith.constant 0 : i32
    %c0_i32_0 = arith.constant 0 : i32
    %c0_i32_1 = arith.constant 0 : i32
    return %c0_i32, %c0_i32_0 : i32, i32
  }
  func.func @transform_8(%arg0: i32) -> (i32, i32) {
    %c0_i32 = arith.constant 0 : i32
    %c0_i32_0 = arith.constant 0 : i32
    return %arg0, %c0_i32 : i32, i32
  }
}

</mosaic_0001>

<bundles_post_ra>
// kernel: tpu_custom_call.1
= control target key start
LH: loop header
LB: loop body
LE: loop exit
PB: predicated region body
PF: predicated region fallthrough
CT: control target
= control target key end

     0   :  { %vm33_vm0 = vcmask 64512   ;;  %vm69_vm1 = vcmask 1043456   ;;  %v1223_v0 = vmov 0.0   ;;  %vm44_vm2 = vcmask 31744   ;;  %s1501_s1 = inlined_call_operand.vmem [shape: f32[4,19], index: 1, kind: input, shape index: {}]   ;;  %s1502_s7 = inlined_call_operand.vmem [shape: f32[16,3], index: 7, kind: input, shape index: {}]   ;;  %s1503_s8 = inlined_call_operand.vmem [shape: f32[64,3], index: 8, kind: output, shape index: {}]   ;;  %s1504_s0 = inlined_call_operand.vmem [shape: f32[64,4], index: 0, kind: input, shape index: {}]   ;;  %s1505_s4 = inlined_call_operand.vmem [shape: f32[8,8], index: 4, kind: input, shape index: {}]   ;;  %s1506_s5 = inlined_call_operand.vmem [shape: f32[8,8], index: 5, kind: input, shape index: {}]   ;;  %s1507_s6 = inlined_call_operand.vmem [shape: f32[1,8], index: 6, kind: input, shape index: {}]   ;;  %s1508_s2 = inlined_call_operand.vmem [shape: f32[16,8], index: 2, kind: input, shape index: {}]   ;;  %s1509_s3 = inlined_call_operand.vmem [shape: f32[8,8], index: 3, kind: input, shape index: {}]  }
   0x1   :  { %34 = vst.msk [vmem:[#allocation2] sm:$0xff] %vm33_vm0, %v1223_v0  ;;  %v43_v1 = vld [vmem:[%s1501_s1] sm:$0xf]  ;;  %v36_v4 = vld [vmem:[%s1504_s0 + $0x8] sm:$0xff]  ;;  %v37_v6 = vld [vmem:[%s1504_s0 + $0x10] sm:$0xff]  ;;  %v193_v10 = vlaneseq  ;;  %vm178_vm4 = vcmask 154624  }
   0x2   :  { %v35_v2 = vld [vmem:[%s1504_s0] sm:$0xff]  ;;  %1090 = vmatprep.subr.msk.mxu0 %vm69_vm1, %v43_v1  ;;  %1152 = vmatprep.subr.msk.mxu1 %vm69_vm1, %v43_v1  ;;  %v40_v5 = vld [vmem:[%s1504_s0 + $0x28] sm:$0xff]  ;;  %v41_v7 = vld [vmem:[%s1504_s0 + $0x30] sm:$0xff] }
   0x3   :  { %v39_v3 = vld [vmem:[%s1504_s0 + $0x20] sm:$0xff]  ;;  %1091 = vmatpush3.msk.msra.mxu0 %vm69_vm1, %v43_v1  ;;  %1153 = vmatpush3.msk.msra.mxu1 %vm69_vm1, %v43_v1  ;;  %v38_v8 = vld [vmem:[%s1504_s0 + $0x18] sm:$0xff]  ;;  %v1317_v11 = vshrl.u32 %v193_v10, 7  ;;  %v196_v12 = vand.u32 127, %v193_v10  ;;  %v1350_v19 = vld [vmem:[%s1508_s2 + $0x8] sm:$0xff] }
   0x4   :  { %1092 = vmatprep.mubr.msk.f32.mxu0 %vm44_vm2, %v35_v2  ;;  %1098 = vmatprep.mubr.msk.f32.mxu1 %vm44_vm2, %v39_v3  ;;  %v42_v9 = vld [vmem:[%s1504_s0 + $0x38] sm:$0xff]  ;;  %v1323_v13 = vld [vmem:[%s1507_s6] ss:$0 sm:$0xff] }
   0x5   :  { %1093 = vmatmul.mubr.msk.f32.vlgmr.msra.gmra.mxu0 %vm44_vm2, %v36_v4  ;;  %1099 = vmatmul.mubr.msk.f32.vlgmr.msra.gmra.mxu1 %vm44_vm2, %v40_v5  ;;  %vm197_vm3 = vcmp.eq.s32.totalorder %v1317_v11, %v196_v12  ;;  %v1328_v14 = vld [vmem:[%s1506_s5] sm:$0xff] }
   0x6   :  { %1095 = vmatprep.mubr.msk.f32.mxu0 %vm44_vm2, %v37_v6  ;;  %1101 = vmatprep.mubr.msk.f32.mxu1 %vm44_vm2, %v41_v7  ;;  %v1333_v15 = vld [vmem:[%s1505_s4] sm:$0xff]  ;;  %v1335_v16 = vsel %vm197_vm3, 1.0, %v1223_v0 }
   0x7   :  { %v1340_v17 = vld [vmem:[%s1509_s3] sm:$0xff] }
   0x8   :  { %v1345_v18 = vld [vmem:[%s1508_s2] sm:$0xff]  ;;  %s1362_s2 = smov 0  }
   0x9   :  { %1096 = vmatmul.mubr.msk.f32.gmra.mxu0 %vm44_vm2, %v38_v8  ;;  %1102 = vmatmul.mubr.msk.f32.gmra.mxu1 %vm44_vm2, %v42_v9  ;;  %v200_v20 = vld [vmem:[#allocation2] sm:$0xff]  }
  0xc5   :  { %v1094_v21 = vpop.f32.mrf.mxu0  ;;  %v1100_v22 = vpop.f32.mrf.mxu1 }
  0xc6   :  { %180 = vst.msk [vmem:[#allocation3 + $0x8] sm:$0xff] %vm178_vm4, %v1094_v21  ;;  %184 = vst.msk [vmem:[#allocation3 + $0x28] sm:$0xff] %vm178_vm4, %v1100_v22 }
  0xc7   :  { %v139_v23 = vpop.f32.mrf.mxu0  ;;  %v159_v24 = vpop.f32.mrf.mxu1 }
  0xc8   :  { %179 = vst.msk [vmem:[#allocation3] sm:$0xff] %vm178_vm4, %v139_v23  ;;  %183 = vst.msk [vmem:[#allocation3 + $0x20] sm:$0xff] %vm178_vm4, %v159_v24 }
  0xc9   :  { %v1097_v25 = vpop.f32.mrf.mxu0  ;;  %v1103_v26 = vpop.f32.mrf.mxu1 }
  0xca   :  { %182 = vst.msk [vmem:[#allocation3 + $0x18] sm:$0xff] %vm178_vm4, %v1097_v25  ;;  %186 = vst.msk [vmem:[#allocation3 + $0x38] sm:$0xff] %vm178_vm4, %v1103_v26 }
  0xcb   :  { %v149_v27 = vpop.f32.mrf.mxu0  ;;  %v169_v28 = vpop.f32.mrf.mxu1 }
  0xcc   :  { %181 = vst.msk [vmem:[#allocation3 + $0x10] sm:$0xff] %vm178_vm4, %v149_v27  ;;  %185 = vst.msk [vmem:[#allocation3 + $0x30] sm:$0xff] %vm178_vm4, %v169_v28 }
  0xcd LB: > { %v1224_v29 = vmov 0.0   ;;  %vm1225_vm5 = vmmov 0   ;;  %s1373_s3 = sshll.u32 %s1221_s2, 3  ;;  %s1226_s9 = smov 120   ;;  %v1227_v31 = vmov 0   ;;  %v1228_v38 = vmov 1   ;;  %s1221_s2 = sphi %s1362_s2, %s206_s2   ;;  %v1217_v20 = vphi %v200_v20, %v1510_v20  }
  0xce   : > { %1104 = vmatprep.subr.mxu0 %v1224_v29  ;;  %1106 = vmatprep.mubr.msk.f32.mxu0 %vm1225_vm5, %v1224_v29  ;;  %s209_s4 = scalar_lea.vmem [#allocation3], %s1373_s3  ;;  %v305_v39 = vsub.s32 0, %v1317_v11  ;;  %v1229_v46 = vmov 2   ;;  %v325_v47 = vsub.s32 1, %v1317_v11  ;;  %v1230_v60 = vmov 3   ;;  %s668_s10 = scalar_lea.vmem [#allocation5], %s1373_s3 }
  0xcf   : > { %1105 = vmatpush3.msra.mxu0 %v1333_v15  ;;  %1109 = vmatprep.subr.mxu1 %v1224_v29  ;;  %v345_v61 = vsub.s32 2, %v1317_v11  ;;  %v1231_v8 = vmov 4   ;;  %v365_v9 = vsub.s32 3, %v1317_v11  ;;  %v1232_v28 = vmov 5   ;;  %s666_s11 = scalar_lea.vmem [#allocation4], %s1373_s3  ;;  %s206_s2 = sadd.s32 1, %s1221_s2  }
  0xd0   : > { %1107 = vmatmul.mubr.msk.f32.vlgmr.msra.gmra.mxu0 %vm33_vm0, %v1217_v20  ;;  %1114 = vmatprep.subr.mxu0 %v1224_v29  ;;  %v306_v40 = vrot.slane %v1328_v14, %v305_v39  ;;  %v312_v48 = vrot.slane %v1335_v16, %v305_v39  ;;  %v326_v49 = vrot.slane %v1328_v14, %v325_v47  ;;  %p203_p0 = scmp.ge.s32.totalorder %s206_s2, 8  }
  0xd1   : > { %1115 = vmatpush3.msra.mxu0 %v1345_v18  ;;  %1116 = vmatprep.mubr.msk.f32.mxu0 %vm1225_vm5, %v1224_v29  ;;  %v332_v50 = vrot.slane %v1335_v16, %v325_v47  ;;  %v346_v62 = vrot.slane %v1328_v14, %v345_v61  ;;  %v352_v63 = vrot.slane %v1335_v16, %v345_v61  ;;  %vm996_vm6 = vcmask (%p203_p0), 23552  }
  0xd2   : > { %1110 = vmatpush3.msra.mxu1 %v1350_v19  ;;  %1111 = vmatprep.mubr.msk.f32.mxu1 %vm1225_vm5, %v1224_v29  ;;  %v366_v10 = vrot.slane %v1328_v14, %v365_v9  ;;  %v372_v12 = vrot.slane %v1335_v16, %v365_v9  ;;  %v675_v19 = vld [vmem:[#allocation3 + $0x8] sm:$0xff] (%p203_p0) }
  0xd3   : > { %v1379_v30 = vld [vmem:[%s209_s4] sm:$0xff]  ;;  %1119 = vmatprep.subr.mxu1 %v1224_v29  ;;  %1183 = vset.pattern.permute.xlu0 %v1227_v31  ;;  %v385_v31 = vsub.s32 4, %v1317_v11  ;;  %v676_v18 = vld [vmem:[#allocation3 + $0x10] sm:$0xff] (%p203_p0) }
  0xd4   : > { %212 = vrot.lane.b32.xlu0 %v1379_v30, %s1226_s9  ;;  %1117 = vmatmul.mubr.msk.f32.vlgmr.msra.gmra.mxu0 %vm33_vm0, %v1217_v20 }
  0xd5   : > { %1184 = vset.pattern.permute.xlu1 %v1228_v38 }
 0x146   : > { %v213_v32 = vpop.permute.xlu0 %212 }
 0x190   : > { %v285_v33 = vpop.f32.mrf.mxu0 }
 0x191   : > { %v1390_v34 = vadd.f32 %v285_v33, %v213_v32  ;;  %v386_v32 = vrot.slane %v1328_v14, %v385_v31  ;;  %v392_v33 = vrot.slane %v1335_v16, %v385_v31 }
 0x192   : > { %v1108_v35 = vpop.f32.mrf.mxu0 }
 0x193   : > { %v296_v36 = vmul.f32 %v1323_v13, %v1390_v34 }
 0x195   : > { %1191 = vtanh.f32 %v296_v36 }
 0x1a2   : > { %v1192_v37 = vpop.eup %1191 }
 0x1a3   : > { %300 = vperm.xlu0 %1183, %v1192_v37  }
 0x1a7   : > { %1187 = vset.pattern.permute.xlu0 %v1231_v8 }
 0x21e   : > { %v301_v41 = vpop.permute.xlu0 %300 }
 0x21f   : > { %v307_v42 = vmul.f32 %v306_v40, %v301_v41  ;;  %v313_v52 = vmul.f32 %v312_v48, %v301_v41 }
 0x221   : > { %v315_v43 = vadd.f32 %v307_v42, %v1390_v34 }
 0x223   : > { %v316_v44 = vmul.f32 %v1323_v13, %v315_v43  ;;  %v1233_v43 = vmov 6  }
 0x225   : > { %1193 = vtanh.f32 %v316_v44  ;;  %v405_v44 = vsub.s32 5, %v1317_v11 }
 0x232   : > { %v1194_v45 = vpop.eup %1193 }
 0x233   : > { %320 = vperm.xlu1 %1184, %v1194_v45   ;;  %v406_v45 = vrot.slane %v1328_v14, %v405_v44 }
 0x237   : > { %1185 = vset.pattern.permute.xlu1 %v1229_v46  ;;  %v412_v46 = vrot.slane %v1335_v16, %v405_v44 }
 0x2ae   : > { %v321_v51 = vpop.permute.xlu1 %320 }
 0x2af   : > { %v327_v53 = vmul.f32 %v326_v49, %v321_v51  ;;  %v333_v54 = vmul.f32 %v332_v50, %v321_v51 }
 0x2b1   : > { %v328_v55 = vadd.f32 %v327_v53, %v307_v42  ;;  %v334_v56 = vadd.f32 %v333_v54, %v313_v52 }
 0x2b3   : > { %v335_v57 = vadd.f32 %v328_v55, %v1390_v34 }
 0x2b5   : > { %v336_v58 = vmul.f32 %v1323_v13, %v335_v57 }
 0x2b7   : > { %1195 = vtanh.f32 %v336_v58 }
 0x2c4   : > { %v1196_v59 = vpop.eup %1195 }
 0x2c5   : > { %340 = vperm.xlu1 %1185, %v1196_v59  }
 0x2c9   : > { %1186 = vset.pattern.permute.xlu1 %v1230_v60 }
 0x340   : > { %v341_v0 = vpop.permute.xlu1 %340 }
 0x341   : > { %v347_v1 = vmul.f32 %v346_v62, %v341_v0  ;;  %v353_v2 = vmul.f32 %v352_v63, %v341_v0 }
 0x343   : > { %v348_v3 = vadd.f32 %v347_v1, %v328_v55  ;;  %v354_v4 = vadd.f32 %v353_v2, %v334_v56  ;;  %v1234_v55 = vmov 7   ;;  %v425_v56 = vsub.s32 6, %v1317_v11 }
 0x345   : > { %v355_v5 = vadd.f32 %v348_v3, %v1390_v34  ;;  %v426_v57 = vrot.slane %v1328_v14, %v425_v56  ;;  %v432_v58 = vrot.slane %v1335_v16, %v425_v56 }
 0x347   : > { %v356_v6 = vmul.f32 %v1323_v13, %v355_v5  ;;  %v445_v5 = vsub.s32 7, %v1317_v11 }
 0x349   : > { %1197 = vtanh.f32 %v356_v6  ;;  %v446_v6 = vrot.slane %v1335_v16, %v445_v5 }
 0x356   : > { %v1198_v7 = vpop.eup %1197 }
 0x357   : > { %360 = vperm.xlu1 %1186, %v1198_v7  }
 0x35b   : > { %1188 = vset.pattern.permute.xlu1 %v1232_v28  ;;  %v677_v28 = vld [vmem:[#allocation3 + $0x18] sm:$0xff] (%p203_p0) }
 0x3d2   : > { %v361_v20 = vpop.permute.xlu1 %360 }
 0x3d3   : > { %v367_v21 = vmul.f32 %v366_v10, %v361_v20  ;;  %v373_v22 = vmul.f32 %v372_v12, %v361_v20 }
 0x3d5   : > { %v368_v23 = vadd.f32 %v367_v21, %v348_v3  ;;  %v374_v24 = vadd.f32 %v373_v22, %v354_v4  ;;  %v588_v3 = vpop.f32.mrf.mxu0 }
 0x3d7   : > { %v375_v25 = vadd.f32 %v368_v23, %v1390_v34  ;;  %v1118_v4 = vpop.f32.mrf.mxu0 }
 0x3d9   : > { %v376_v26 = vmul.f32 %v1323_v13, %v375_v25 }
 0x3db   : > { %1199 = vtanh.f32 %v376_v26 }
 0x3e8   : > { %v1200_v27 = vpop.eup %1199 }
 0x3e9   : > { %380 = vperm.xlu0 %1187, %v1200_v27  }
 0x3ed   : > { %1190 = vset.pattern.permute.xlu0 %v1234_v55 }
 0x464   : > { %v381_v35 = vpop.permute.xlu0 %380 }
 0x465   : > { %v387_v36 = vmul.f32 %v386_v32, %v381_v35  ;;  %v393_v37 = vmul.f32 %v392_v33, %v381_v35 }
 0x467   : > { %v388_v38 = vadd.f32 %v387_v36, %v368_v23  ;;  %v394_v39 = vadd.f32 %v393_v37, %v374_v24  ;;  %v679_v36 = vld [vmem:[#allocation3 + $0x28] sm:$0xff] (%p203_p0)  ;;  %v678_v37 = vld [vmem:[#allocation3 + $0x20] sm:$0xff] (%p203_p0) }
 0x469   : > { %v395_v40 = vadd.f32 %v388_v38, %v1390_v34 }
 0x46b   : > { %v396_v41 = vmul.f32 %v1323_v13, %v395_v40  ;;  %v681_v40 = vld [vmem:[#allocation3 + $0x38] sm:$0xff] (%p203_p0) }
 0x46d   : > { %1201 = vtanh.f32 %v396_v41  ;;  %v680_v41 = vld [vmem:[#allocation3 + $0x30] sm:$0xff] (%p203_p0) }
 0x47a   : > { %v1202_v42 = vpop.eup %1201 }
 0x47b   : > { %400 = vperm.xlu1 %1188, %v1202_v42  }
 0x47f   : > { %1189 = vset.pattern.permute.xlu1 %v1233_v43 }
 0x4f6   : > { %v401_v47 = vpop.permute.xlu1 %400 }
 0x4f7   : > { %v407_v48 = vmul.f32 %v406_v45, %v401_v47  ;;  %v413_v49 = vmul.f32 %v412_v46, %v401_v47 }
 0x4f9   : > { %v408_v50 = vadd.f32 %v407_v48, %v388_v38  ;;  %v414_v51 = vadd.f32 %v413_v49, %v394_v39 }
 0x4fb   : > { %v415_v52 = vadd.f32 %v408_v50, %v1390_v34 }
 0x4fd   : > { %v416_v53 = vmul.f32 %v1323_v13, %v415_v52 }
 0x4ff   : > { %1203 = vtanh.f32 %v416_v53 }
 0x50c   : > { %v1204_v54 = vpop.eup %1203 }
 0x50d   : > { %420 = vperm.xlu1 %1189, %v1204_v54  }
 0x588   : > { %v421_v59 = vpop.permute.xlu1 %420 }
 0x589   : > { %v427_v60 = vmul.f32 %v426_v57, %v421_v59  ;;  %v433_v61 = vmul.f32 %v432_v58, %v421_v59 }
 0x58b   : > { %v428_v62 = vadd.f32 %v427_v60, %v408_v50  ;;  %v434_v63 = vadd.f32 %v433_v61, %v414_v51 }
 0x58d   : > { %v435_v0 = vadd.f32 %v428_v62, %v1390_v34 }
 0x58f   : > { %v436_v1 = vmul.f32 %v1323_v13, %v435_v0 }
 0x591   : > { %1205 = vtanh.f32 %v436_v1 }
 0x59e   : > { %v1206_v2 = vpop.eup %1205 }
 0x59f   : > { %440 = vperm.xlu0 %1190, %v1206_v2  }
 0x61a   : > { %v441_v7 = vpop.permute.xlu0 %440 }
 0x61b   : > { %v447_v8 = vmul.f32 %v446_v6, %v441_v7 }
 0x61d   : > { %v448_v9 = vadd.f32 %v447_v8, %v434_v63 }
 0x61f   : > { %669 = vst.msk [vmem:[%s668_s10] sm:$0xff] %vm33_vm0, %v448_v9  ;;  %1112 = vmatmul.mubr.msk.f32.vlgmr.msra.gmra.mxu1 %vm33_vm0, %v448_v9 }
 0x620   : > { %1120 = vmatpush3.msra.mxu1 %v1340_v17  ;;  %1121 = vmatprep.mubr.msk.f32.mxu1 %vm1225_vm5, %v1224_v29  ;;  %v673_v29 = vld [vmem:[%s1502_s7 + $0x8] sm:$0xff] (%p203_p0) }
 0x621   :  { %1124 = vmatprep.subr.mxu0 (%p203_p0), %v673_v29  ;;  %v674_v17 = vld [vmem:[#allocation3] sm:$0xff] (%p203_p0) }
 0x622   :  { %1125 = vmatpush3.msra.mxu0 (%p203_p0), %v673_v29 }
 0x626   :  { %v690_v23 = vld [vmem:[#allocation5] sm:$0xff] (%p203_p0)  ;;  %v691_v25 = vld [vmem:[#allocation5 + $0x8] sm:$0xff] (%p203_p0)  ;;  %v692_v27 = vld [vmem:[#allocation5 + $0x10] sm:$0xff] (%p203_p0) }
 0x627   :  { %1126 = vmatprep.mubr.msk.f32.mxu0 (%p203_p0), %vm33_vm0, %v690_v23  ;;  %v693_v13 = vld [vmem:[#allocation5 + $0x18] sm:$0xff] (%p203_p0)  ;;  %v694_v15 = vld [vmem:[#allocation5 + $0x20] sm:$0xff] (%p203_p0)  ;;  %v695_v31 = vld [vmem:[#allocation5 + $0x28] sm:$0xff] (%p203_p0) }
 0x628   :  { %1127 = vmatmul.mubr.msk.f32.vlgmr.msra.gmra.mxu0 (%p203_p0), %vm33_vm0, %v691_v25  ;;  %v696_v33 = vld [vmem:[#allocation5 + $0x30] sm:$0xff] (%p203_p0)  ;;  %v697_v38 = vld [vmem:[#allocation5 + $0x38] sm:$0xff] (%p203_p0) }
 0x629   :  { %1129 = vmatprep.mubr.msk.f32.mxu0 (%p203_p0), %vm33_vm0, %v692_v27 }
 0x62c   :  { %1130 = vmatmul.mubr.msk.f32.gmra.mxu0 (%p203_p0), %vm33_vm0, %v693_v13 }
 0x62d   :  { %1132 = vmatprep.mubr.msk.f32.mxu0 (%p203_p0), %vm33_vm0, %v694_v15 }
 0x630   :  { %1133 = vmatmul.mubr.msk.f32.gmra.mxu0 (%p203_p0), %vm33_vm0, %v695_v31 }
 0x631   :  { %1135 = vmatprep.mubr.msk.f32.mxu0 (%p203_p0), %vm33_vm0, %v696_v33 }
 0x634   :  { %1136 = vmatmul.mubr.msk.f32.gmra.mxu0 (%p203_p0), %vm33_vm0, %v697_v38 }
 0x6df   : > { %v518_v34 = vpop.f32.mrf.mxu1 }
 0x6e0   : > { %v589_v10 = vadd.f32 %v588_v3, %v518_v34 }
 0x6e1   : > { %v1113_v12 = vpop.f32.mrf.mxu1 }
 0x6e2   : > { %v592_v20 = vadd.f32 %v589_v10, %v1379_v30  ;;  %v672_v30 = vld [vmem:[%s1502_s7] sm:$0xff] (%p203_p0)  ;;  %s1235_s7 = smov (%p203_p0), 112  }
 0x6e3   :  { %1138 = vmatprep.subr.mxu1 (%p203_p0), %v672_v30  ;;  %964 = vrot.lane.b32.xlu0 (%p203_p0), %v674_v17, %s1235_s7 }
 0x6e4   : > { %1122 = vmatmul.mubr.msk.f32.vlgmr.msra.gmra.mxu1 %vm33_vm0, %v592_v20  ;;  %968 = vrot.lane.b32.xlu1 (%p203_p0), %v676_v18, %s1235_s7 }
 0x6e5   :  { %1139 = vmatpush3.msra.mxu1 (%p203_p0), %v672_v30 }
 0x6e7   :  { %966 = vrot.lane.b32.xlu0 (%p203_p0), %v675_v19, %s1235_s7 }
 0x6e8   :  { %970 = vrot.lane.b32.xlu1 (%p203_p0), %v677_v28, %s1235_s7  ;;  %v1128_v46 = vpop.f32.mrf.mxu0 (%p203_p0) }
 0x6ea   :  { %v788_v49 = vpop.f32.mrf.mxu0 (%p203_p0) }
 0x6eb   :  { %972 = vrot.lane.b32.xlu0 (%p203_p0), %v678_v37, %s1235_s7 }
 0x6ec   :  { %974 = vrot.lane.b32.xlu1 (%p203_p0), %v679_v36, %s1235_s7  ;;  %v1131_v53 = vpop.f32.mrf.mxu0 (%p203_p0) }
 0x6ee   :  { %v798_v58 = vpop.f32.mrf.mxu0 (%p203_p0) }
 0x6ef   :  { %976 = vrot.lane.b32.xlu0 (%p203_p0), %v680_v41, %s1235_s7 }
 0x6f0   :  { %978 = vrot.lane.b32.xlu1 (%p203_p0), %v681_v40, %s1235_s7  ;;  %v1134_v63 = vpop.f32.mrf.mxu0 (%p203_p0) }
 0x6f2   :  { %v808_v3 = vpop.f32.mrf.mxu0 (%p203_p0) }
 0x6f4   :  { %v1137_v8 = vpop.f32.mrf.mxu0 (%p203_p0) }
 0x755   :  { %v965_v42 = vpop.permute.xlu0 (%p203_p0), %964 }
 0x756   :  { %v969_v43 = vpop.permute.xlu1 (%p203_p0), %968 }
 0x759   :  { %v967_v44 = vpop.permute.xlu0 (%p203_p0), %966 }
 0x75a   :  { %v971_v45 = vpop.permute.xlu1 (%p203_p0), %970 }
 0x75d   :  { %v973_v62 = vpop.permute.xlu0 (%p203_p0), %972 }
 0x75e   :  { %v975_v57 = vpop.permute.xlu1 (%p203_p0), %974 }
 0x761   :  { %v977_v12 = vpop.permute.xlu0 (%p203_p0), %976 }
 0x762   :  { %v979_v7 = vpop.permute.xlu1 (%p203_p0), %978 }
 0x7a2   :  { %205 = sbr.rel (!%p203_p0) target bundleno = 205 (0xcd), region = 66 }
 0x7a4   : > { %v662_v21 = vpop.f32.mrf.mxu1  }
 0x7a5   : > { %667 = vst.msk [vmem:[%s666_s11] sm:$0xff] %vm33_vm0, %v662_v21  ;;  %v1510_v20 = vmov %v662_v21  ;;  %671 = vst.msk [vmem:[#allocation2] sm:$0xff] (%p203_p0), %vm33_vm0, %v662_v21 }
 0x7a6   : > { %v1123_v22 = vpop.f32.mrf.mxu1  ;;  %v818_v20 = vpop.f32.mrf.mxu0 (%p203_p0) }
 0x7ac   :  { %v682_v24 = vld [vmem:[#allocation4] sm:$0xff]  ;;  %v683_v26 = vld [vmem:[#allocation4 + $0x8] sm:$0xff]  ;;  %v684_v11 = vld [vmem:[#allocation4 + $0x10] sm:$0xff] }
 0x7ad   :  { %1140 = vmatprep.mubr.msk.f32.mxu1 %vm33_vm0, %v682_v24  ;;  %v685_v14 = vld [vmem:[#allocation4 + $0x18] sm:$0xff]  ;;  %v686_v16 = vld [vmem:[#allocation4 + $0x20] sm:$0xff]  ;;  %v687_v32 = vld [vmem:[#allocation4 + $0x28] sm:$0xff] }
 0x7ae   :  { %1141 = vmatmul.mubr.msk.f32.vlgmr.msra.gmra.mxu1 %vm33_vm0, %v683_v26  ;;  %v688_v35 = vld [vmem:[#allocation4 + $0x30] sm:$0xff]  ;;  %v689_v39 = vld [vmem:[#allocation4 + $0x38] sm:$0xff] }
 0x7af   :  { %1143 = vmatprep.mubr.msk.f32.mxu1 %vm33_vm0, %v684_v11 }
 0x7b2   :  { %1144 = vmatmul.mubr.msk.f32.gmra.mxu1 %vm33_vm0, %v685_v14 }
 0x7b3   :  { %1146 = vmatprep.mubr.msk.f32.mxu1 %vm33_vm0, %v686_v16 }
 0x7b6   :  { %1147 = vmatmul.mubr.msk.f32.gmra.mxu1 %vm33_vm0, %v687_v32 }
 0x7b7   :  { %1149 = vmatprep.mubr.msk.f32.mxu1 %vm33_vm0, %v688_v35 }
 0x7ba   :  { %1150 = vmatmul.mubr.msk.f32.gmra.mxu1 %vm33_vm0, %v689_v39 }
 0x86e   :  { %v1142_v47 = vpop.f32.mrf.mxu1 }
 0x86f   :  { %v923_v48 = vadd.f32 %v1142_v47, %v1128_v46 }
 0x870   :  { %v917_v50 = vpop.f32.mrf.mxu1 }
 0x871   :  { %v989_v51 = vadd.f32 %v967_v44, %v923_v48  ;;  %v918_v52 = vadd.f32 %v917_v50, %v788_v49 }
 0x872   :  { %v1145_v54 = vpop.f32.mrf.mxu1 }
 0x873   :  { %998 = vst.msk [vmem:[%s1503_s8 + $0x8] sm:$0xff] %vm996_vm6, %v989_v51  ;;  %v988_v55 = vadd.f32 %v965_v42, %v918_v52  ;;  %v933_v56 = vadd.f32 %v1145_v54, %v1131_v53 }
 0x874   :  { %v927_v59 = vpop.f32.mrf.mxu1 }
 0x875   :  { %997 = vst.msk [vmem:[%s1503_s8] sm:$0xff] %vm996_vm6, %v988_v55  ;;  %v991_v60 = vadd.f32 %v971_v45, %v933_v56  ;;  %v928_v61 = vadd.f32 %v927_v59, %v798_v58 }
 0x876   :  { %v1148_v0 = vpop.f32.mrf.mxu1 }
 0x877   :  { %1000 = vst.msk [vmem:[%s1503_s8 + $0x18] sm:$0xff] %vm996_vm6, %v991_v60  ;;  %v990_v1 = vadd.f32 %v969_v43, %v928_v61  ;;  %v943_v2 = vadd.f32 %v1148_v0, %v1134_v63 }
 0x878   :  { %v937_v4 = vpop.f32.mrf.mxu1 }
 0x879   :  { %999 = vst.msk [vmem:[%s1503_s8 + $0x10] sm:$0xff] %vm996_vm6, %v990_v1  ;;  %v993_v5 = vadd.f32 %v975_v57, %v943_v2  ;;  %v938_v6 = vadd.f32 %v937_v4, %v808_v3 }
 0x87a   :  { %v1151_v9 = vpop.f32.mrf.mxu1 }
 0x87b   :  { %1002 = vst.msk [vmem:[%s1503_s8 + $0x28] sm:$0xff] %vm996_vm6, %v993_v5  ;;  %v992_v34 = vadd.f32 %v973_v62, %v938_v6  ;;  %v953_v10 = vadd.f32 %v1151_v9, %v1137_v8 }
 0x87c   :  { %v947_v21 = vpop.f32.mrf.mxu1 }
 0x87d   :  { %1001 = vst.msk [vmem:[%s1503_s8 + $0x20] sm:$0xff] %vm996_vm6, %v992_v34  ;;  %v995_v22 = vadd.f32 %v979_v7, %v953_v10  ;;  %v948_v29 = vadd.f32 %v947_v21, %v818_v20 }
 0x87f   :  { %1004 = vst.msk [vmem:[%s1503_s8 + $0x38] sm:$0xff] %vm996_vm6, %v995_v22  ;;  %v994_v30 = vadd.f32 %v977_v12, %v948_v29 }
 0x881   :  { %1003 = vst.msk [vmem:[%s1503_s8 + $0x30] sm:$0xff] %vm996_vm6, %v994_v30 }

</bundles_post_ra>
